<compile_context>
chip_gen: v6e
topology: v6e:2x2x1
jax: 0.10.0
libtpu: 0.0.40
codegen_flags: <defaults>
</compile_context>

<pallas_src>
import math

import jax
import jax.numpy as jnp
from jax.experimental import pallas as pl
from jax.experimental.pallas import tpu as pltpu

_EPSILON = 1e-6


def _ce_kernel(preds_ref, targets_ref, weight_ref, out_ref, acc_ref):
    """Grid = (parallel chunk p, reduction step t)."""
    t = pl.program_id(1)

    @pl.when(t == 0)
    def _():
        acc_ref[...] = jnp.zeros_like(acc_ref)

    r, w = preds_ref.shape
    p = preds_ref[...].astype(jnp.float32)
    tg = targets_ref[...].astype(jnp.float32)
    loss = -tg * jnp.log(p + jnp.float32(_EPSILON))
    loss = loss * weight_ref[...]                         # (r, w) * (1, w)
    # Reduce the tile into the (8, w) accumulator with plain vreg adds (VPU).
    acc_ref[...] += jnp.sum(loss.reshape(r // 8, 8, w), axis=0)

    @pl.when(t == pl.num_programs(1) - 1)
    def _():
        out_ref[...] = acc_ref[...]


def ce_loss(preds, targets, weight=None, *,
            vmem_budget_bytes=16 * 1024 * 1024,
            parallel_chunks=2):
    """Pallas CELoss forward.

    preds/targets: (N, C) or (N, C, L), any float dtype (bf16/f32).
    weight: None, scalar, or per-class vector of length C.
    """
    if preds.ndim == 3:
        # TODO(synk): for vector weights PyTorch broadcasts over the L axis (usually
        # a shape error); here the weight is applied along the class axis instead.
        n, c, l = preds.shape
        preds = jnp.transpose(preds, (0, 2, 1)).reshape(n * l, c)
        targets = jnp.transpose(targets, (0, 2, 1)).reshape(n * l, c)

    N, C = preds.shape
    n_total = N                                      # .sum(1).mean() divisor
    itemsize = jnp.dtype(preds.dtype).itemsize

    # Per-class weight row (f32); scalars broadcast.
    if weight is None:
        weight = 1.0
    w_vec = jnp.broadcast_to(jnp.asarray(weight, jnp.float32).reshape(-1), (C,))

    # --- lane-dense layout: make the lane (last) axis a multiple of 128 -------
    if C % 128 == 0:
        W, k = C, 1
    else:
        W = (C * 128) // math.gcd(C, 128)            # lcm(C, 128)
        max_width = vmem_budget_bytes // (8 * 4 * itemsize)
        if W <= max_width:
            k = W // C                                # merge k rows per wide row
        else:
            # Very wide class axis: pad classes instead (zero targets -> zero loss).
            pad_c = (-C) % 128
            preds = jnp.pad(preds, ((0, 0), (0, pad_c)))
            targets = jnp.pad(targets, ((0, 0), (0, pad_c)))
            w_vec = jnp.pad(w_vec, (0, pad_c))
            W, k = C + pad_c, 1

    if k > 1:
        pad_n = (-N) % k
        if pad_n:
            preds = jnp.pad(preds, ((0, pad_n), (0, 0)))
            targets = jnp.pad(targets, ((0, pad_n), (0, 0)))
        R = (N + pad_n) // k
        preds = preds.reshape(R, W)
        targets = targets.reshape(R, W)
        w_row = jnp.tile(w_vec[None, :], (1, k))      # weight pattern repeats per row
    else:
        R = preds.shape[0]
        w_row = w_vec[None, :]

    # --- tile sizing from the VMEM budget (2 inputs x 2 pipeline buffers) ------
    tile_r = vmem_budget_bytes // (4 * itemsize * W)
    tile_r = max(8, min(1024, (tile_r // 8) * 8))

    P = max(1, int(parallel_chunks))                  # chunks for v7x dual-TC
    rows_per_chunk = -(-R // P)
    tile_r = min(tile_r, ((rows_per_chunk + 7) // 8) * 8)
    T = -(-rows_per_chunk // tile_r)                  # reduction steps per chunk
    R_pad = P * T * tile_r
    if R_pad > R:                                     # zero rows contribute zero loss
        preds = jnp.pad(preds, ((0, R_pad - R), (0, 0)))
        targets = jnp.pad(targets, ((0, R_pad - R), (0, 0)))

    partials = pl.pallas_call(
        _ce_kernel,
        out_shape=jax.ShapeDtypeStruct((P * 8, W), jnp.float32),
        grid=(P, T),
        in_specs=[
            pl.BlockSpec((tile_r, W), lambda p, t: (p * T + t, 0)),   # preds tile
            pl.BlockSpec((tile_r, W), lambda p, t: (p * T + t, 0)),   # targets tile
            pl.BlockSpec((1, W), lambda p, t: (0, 0)),                # weight row (resident)
        ],
        out_specs=pl.BlockSpec((8, W), lambda p, t: (p, 0)),          # per-chunk partial sums
        scratch_shapes=[pltpu.VMEM((8, W), jnp.float32)],             # vector accumulator
        compiler_params=pltpu.CompilerParams(
            dimension_semantics=("parallel", "arbitrary"),
            vmem_limit_bytes=32 * 1024 * 1024,
        ),
    )(preds, targets, w_row)

    # Finish the reduction + mean on the host side (tiny).
    return jnp.sum(partials) / jnp.float32(n_total)


if __name__ == "__main__":
    key = jax.random.PRNGKey(0)
    k1, k2, k3, k4 = jax.random.split(key, 4)

    # Case 1: (N, Classes) f32 with per-class weights. C=32 exercises the
    # lane-dense row-merge path (4 original rows per 128-lane row).
    N, C = 16, 32
    preds = jax.nn.softmax(jax.random.normal(k1, (N, C), jnp.float32), axis=-1)
    targets = jax.nn.softmax(jax.random.normal(k2, (N, C), jnp.float32), axis=-1)
    weight = jnp.linspace(0.5, 1.5, C, dtype=jnp.float32)

    loss = ce_loss(preds, targets, weight)
    jax.block_until_ready(loss)
    ref = jnp.mean(
        jnp.sum(-targets * jnp.log(preds + _EPSILON) * weight[None, :], axis=1)
    )
    assert jnp.allclose(loss, ref, rtol=1e-5, atol=1e-5), (loss, ref)

    # Case 2: bf16 inputs, default scalar weight — native-dtype streaming path
    # (no wrapper-side f32 cast; upcast happens inside the kernel).
    N2, C2 = 24, 40
    p2 = jax.nn.softmax(jax.random.normal(k3, (N2, C2), jnp.float32), axis=-1).astype(jnp.bfloat16)
    t2 = jax.nn.softmax(jax.random.normal(k4, (N2, C2), jnp.float32), axis=-1).astype(jnp.bfloat16)
    loss2 = ce_loss(p2, t2)
    jax.block_until_ready(loss2)
    p2f, t2f = p2.astype(jnp.float32), t2.astype(jnp.float32)
    ref2 = jnp.mean(jnp.sum(-t2f * jnp.log(p2f + _EPSILON), axis=1))
    assert jnp.allclose(loss2, ref2, rtol=1e-5, atol=1e-5), (loss2, ref2)

    print("KERNEL_OK")
</pallas_src>

<mosaic_0001>
module attributes {stable_mosaic.version = 11 : i64} {
  func.func @_ce_kernel(%arg0: i32, %arg1: i32, %arg2: memref<8x128xf32, #tpu.memory_space<vmem>>, %arg3: memref<8x128xf32, #tpu.memory_space<vmem>>, %arg4: memref<1x128xf32, #tpu.memory_space<vmem>>, %arg5: memref<8x128xf32, #tpu.memory_space<vmem>>, %arg6: memref<8x128xf32, #tpu.memory_space<vmem>>) attributes {dimension_semantics = [#tpu.dimension_semantics<parallel>, #tpu.dimension_semantics<arbitrary>], iteration_bounds = array<i64: 2, 1>, scalar_prefetch = 0 : i64, scratch_operands = 1 : i64, tpu.core_type = #tpu.core_type<tc>, window_params = [{transform_indices = @transform_0, window_bounds = array<i64: 8, 128>}, {transform_indices = @transform_1, window_bounds = array<i64: 8, 128>}, {pipeline_mode = #tpu.pipeline_mode<synchronous>, transform_indices = @transform_2, window_bounds = array<i64: 1, 128>}, {transform_indices = @transform_3, window_bounds = array<i64: 8, 128>}]} {
    %c0_i32 = arith.constant 0 : i32
    %0 = arith.cmpi eq, %arg1, %c0_i32 : i32
    %1 = arith.extui %0 : i1 to i32
    %c0_i32_0 = arith.constant 0 : i32
    %2 = arith.cmpi ne, %1, %c0_i32_0 : i32
    scf.if %2 {
      %cst_14 = arith.constant 0.000000e+00 : f32
      %22 = vector.broadcast %cst_14 : f32 to vector<8x128xf32>
      %c0_15 = arith.constant 0 : index
      %c0_16 = arith.constant 0 : index
      %23 = vector.load %arg6[%c0_15, %c0_16] : memref<8x128xf32, #tpu.memory_space<vmem>>, vector<8x128xf32>
      tpu.vector_store %arg6[%c0_15, %c0_16], %22 {strides = array<i32>} : memref<8x128xf32, #tpu.memory_space<vmem>>, vector<8x128xf32>,
    } else {
    }
    %c0 = arith.constant 0 : index
    %c0_1 = arith.constant 0 : index
    %3 = vector.load %arg2[%c0, %c0_1] : memref<8x128xf32, #tpu.memory_space<vmem>>, vector<8x128xf32>
    %c0_2 = arith.constant 0 : index
    %c0_3 = arith.constant 0 : index
    %4 = vector.load %arg3[%c0_2, %c0_3] : memref<8x128xf32, #tpu.memory_space<vmem>>, vector<8x128xf32>
    %cst = arith.constant 0.000000e+00 : f32
    %5 = vector.broadcast %cst : f32 to vector<8x128xf32>
    %6 = arith.subf %5, %4 : vector<8x128xf32>
    %cst_4 = arith.constant 9.99999997E-7 : f32
    %7 = vector.broadcast %cst_4 : f32 to vector<8x128xf32>
    %8 = arith.addf %3, %7 : vector<8x128xf32>
    %9 = math.log %8 : vector<8x128xf32>
    %10 = arith.mulf %6, %9 : vector<8x128xf32>
    %c0_5 = arith.constant 0 : index
    %c0_6 = arith.constant 0 : index
    %11 = vector.load %arg4[%c0_5, %c0_6] : memref<1x128xf32, #tpu.memory_space<vmem>>, vector<1x128xf32>
    %12 = vector.broadcast %11 : vector<1x128xf32> to vector<8x128xf32>
    %13 = arith.mulf %10, %12 : vector<8x128xf32>
    %c0_7 = arith.constant 0 : index
    %c0_8 = arith.constant 0 : index
    %14 = vector.load %arg6[%c0_7, %c0_8] : memref<8x128xf32, #tpu.memory_space<vmem>>, vector<8x128xf32>
    %15 = vector.shape_cast %13 : vector<8x128xf32> to vector<1x8x128xf32>
    %cst_9 = arith.constant dense<0.000000e+00> : vector<8x128xf32>
    %16 = vector.multi_reduction <add>, %15, %cst_9 [0] : vector<1x8x128xf32> to vector<8x128xf32>
    %17 = arith.addf %14, %16 : vector<8x128xf32>
    %c0_10 = arith.constant 0 : index
    %c0_11 = arith.constant 0 : index
    %18 = vector.load %arg6[%c0_10, %c0_11] : memref<8x128xf32, #tpu.memory_space<vmem>>, vector<8x128xf32>
    tpu.vector_store %arg6[%c0_10, %c0_11], %17 {strides = array<i32>} : memref<8x128xf32, #tpu.memory_space<vmem>>, vector<8x128xf32>,
    %c0_i32_12 = arith.constant 0 : i32
    %19 = arith.cmpi eq, %arg1, %c0_i32_12 : i32
    %20 = arith.extui %19 : i1 to i32
    %c0_i32_13 = arith.constant 0 : i32
    %21 = arith.cmpi ne, %20, %c0_i32_13 : i32
    scf.if %21 {
      %c0_14 = arith.constant 0 : index
      %c0_15 = arith.constant 0 : index
      %22 = vector.load %arg6[%c0_14, %c0_15] : memref<8x128xf32, #tpu.memory_space<vmem>>, vector<8x128xf32>
      %c0_16 = arith.constant 0 : index
      %c0_17 = arith.constant 0 : index
      %23 = vector.load %arg5[%c0_16, %c0_17] : memref<8x128xf32, #tpu.memory_space<vmem>>, vector<8x128xf32>
      tpu.vector_store %arg5[%c0_16, %c0_17], %22 {strides = array<i32>} : memref<8x128xf32, #tpu.memory_space<vmem>>, vector<8x128xf32>,
    } else {
    }
    return
  }
  func.func @transform_0(%arg0: i32, %arg1: i32) -> (i32, i32) {
    %c1_i32 = arith.constant 1 : i32
    %0 = arith.muli %arg0, %c1_i32 : i32
    %1 = arith.addi %0, %arg1 : i32
    %c0_i32 = arith.constant 0 : i32
    %c0_i32_0 = arith.constant 0 : i32
    return %1, %c0_i32 : i32, i32
  }
  func.func @transform_1(%arg0: i32, %arg1: i32) -> (i32, i32) {
    %c1_i32 = arith.constant 1 : i32
    %0 = arith.muli %arg0, %c1_i32 : i32
    %1 = arith.addi %0, %arg1 : i32
    %c0_i32 = arith.constant 0 : i32
    %c0_i32_0 = arith.constant 0 : i32
    return %1, %c0_i32 : i32, i32
  }
  func.func @transform_2(%arg0: i32, %arg1: i32) -> (i32, i32) {
    %c0_i32 = arith.constant 0 : i32
    %c0_i32_0 = arith.constant 0 : i32
    %c0_i32_1 = arith.constant 0 : i32
    return %c0_i32, %c0_i32_0 : i32, i32
  }
  func.func @transform_3(%arg0: i32, %arg1: i32) -> (i32, i32) {
    %c0_i32 = arith.constant 0 : i32
    %c0_i32_0 = arith.constant 0 : i32
    return %arg0, %c0_i32 : i32, i32
  }
}

</mosaic_0001>

<bundles_post_ra>
// kernel: tpu_custom_call.1
= control target key start
LH: loop header
LB: loop body
LE: loop exit
PB: predicated region body
PF: predicated region fallthrough
CT: control target
= control target key end

     0   :  { %8 = vsyncpa [#allocation4], 0  ;;  %s804_s0 = inlined_call_operand.hbm [shape: f32[16,128], index: 0, kind: input, shape index: {}]   ;;  %s805_s1 = inlined_call_operand.hbm [shape: f32[16,128], index: 1, kind: input, shape index: {}]   ;;  %s806_s2 = inlined_call_operand.vmem [shape: f32[1,128], index: 2, kind: input, shape index: {}]   ;;  %s807_s3 = inlined_call_operand.hbm [shape: f32[16,128], index: 3, kind: output, shape index: {}]  }
   0x1   :  { %10 = vsyncpa [#allocation4 + $0x1], 0 }
   0x2   :  { %11 = vsyncpa [#allocation7], 0 }
   0x3   :  { %13 = vsyncpa [#allocation7 + $0x1], 0 }
   0x4   :  { %14 = vsyncpa [#allocation5], 0 }
   0x5   :  { %16 = vsyncpa [#allocation5 + $0x1], 0  ;;  %s640_s12 = smov 0   ;;  %s642_s13 = smov 0  }
   0x6   :  { %s644_s14 = smov 0   ;;  %s646_s15 = smov 0  }
   0x7   :  { %s648_s16 = smov 0   ;;  %s650_s17 = smov 0  }
   0x8 LB: > { %s389_s18 = sadd.s32 4294967295, %s615_s17   ;;  %s390_s19 = sadd.s32 4294967294, %s615_s17   ;;  %s615_s17 = sphi %s650_s17, %s22_s17   ;;  %s611_s16 = sphi %s648_s16, %s819_s16   ;;  %s607_s15 = sphi %s646_s15, %s818_s15   ;;  %s603_s14 = sphi %s644_s14, %s817_s14   ;;  %s599_s13 = sphi %s642_s13, %s816_s13   ;;  %s595_s12 = sphi %s640_s12, %s815_s12  }
   0x9   : > { %s34_s20 = sadd.s32 1, %s611_s16  ;;  %s43_s21 = sadd.s32 1, %s603_s14 }
   0xa   : > { %p36_p0 = scmp.ge.s32.totalorder %s34_s20, 2  ;;  %p50_p1 = scmp.ne.s32.totalorder %s603_s14, %s599_s13 }
   0xb   : > { %p51_p2 = scmp.eq.s32.totalorder %s615_s17, 0  ;;  %p56_p3 = scmp.ne.s32.totalorder %s599_s13, %s595_s12 }
   0xc   : > { %s821_s20 = smov (%p36_p0, %s34_s20), 0  ;;  %p57_p5 = scmp.eq.s32.totalorder %s389_s18, 0 }
   0xd   : > { %p681_p4 = por %p51_p2, %p50_p1  ;;  %s40_s23 = ssub.s32 %s611_s16, %s821_s20 }
   0xe   : > { %p129_p6 = scmp.eq.s32.totalorder %s389_s18, 1  ;;  %p41_p7 = scmp.eq.s32.totalorder %s40_s23, 0 }
   0xf   : > { %p687_p8 = por %p57_p5, %p56_p3  ;;  %p135_p10 = scmp.eq.s32.totalorder %s390_s19, 1 }
  0x10   : > { %p691_p9 = por %p129_p6, %p50_p1  ;;  %p423_p13 = scmp.lt.s32.totalorder %s615_s17, 2 }
  0x11   : > { %s696_s26 = scalar_select %p41_p7, %s603_s14, %s43_s21  }
  0x12   : > { %p698_p11 = por %p135_p10, %p56_p3  ;;  %s705_s28 = sand.u32 1, %s603_s14  }
  0x13   : > { %s393_s29 = sshll.u32 %s705_s28, 3  ;;  %s394_s30 = sshll.u32 %s611_s16, 7 }
  0x14   : > { %s168_s6 = scalar_lea.hbm %s804_s0, %s394_s30  ;;  %s162_s7 = scalar_lea.vmem [#allocation3], %s393_s29 }
  0x15   : > { %s170_s8 = sshll.u32 %s162_s7, 4  ;;  %p714_p0 = pnand %p423_p13, %p681_p4  ;;  %s171_s8 = int_to_ptr.vmem [resolvable:$true] %s170_s8 }
  0x16   : > { %p397_p1 = scmp.ge.s32.totalorder %s615_s17, 1  ;;  %p194_p2 = scmp.lt.s32.totalorder %s615_s17, 3 }
  0x17   : > { %s159_s10 = scalar_lea.sflag [#allocation4], %s705_s28  ;;  %p477_p3 = pneg %p714_p0 }
  0x18   : > { %s488_s11 = scalar_lea.vmem %s171_s8, 128  ;;  %s617_s18 = smov [#allocation3]  }
  0x19   : > { %p489_p5 = scmp.ne.s32.totalorder %s171_s8, %s488_s11  ;;  %s493_s19 = sshll.u32 %s617_s18, 4  ;;  %s494_s19 = int_to_ptr.vmem [resolvable:$false] %s493_s19 }
  0x1a   : > { %s495_s21 = scalar_lea.vmem %s494_s19, 256  ;;  %p496_p4 = scmp.lt.s32.totalorder %s171_s8, %s494_s19 }
  0x1b   : > { %p491_p6 = pnand %p489_p5, %p477_p3  ;;  %p497_p10 = scmp.lt.s32.totalorder %s495_s21, %s488_s11 }
  0x1d   : > { %p492_p7 = pneg %p491_p6  ;;  %p498_p13 = por %p497_p10, %p496_p4 }
  0x1f   : > { %p499_p12 = pnand %p498_p13, %p492_p7 }
  0x21   : > { %502 = shalt.err (!%p499_p12)
}
  0x22   : > { %415 = dma.hbm_to_vmem [thread:$0]  (!%p714_p0), %s168_s6, 128, %s171_s8, %s159_s10  }
  0x23   : > { %p732_p5 = pnand %p397_p1, %p194_p2  ;;  %s187_s5 = scalar_lea.hbm %s805_s1, %s394_s30 }
  0x24   : > { %s181_s7 = scalar_lea.vmem [#allocation6], %s393_s29  ;;  %s178_s18 = scalar_lea.sflag [#allocation7], %s705_s28 }
  0x25   : > { %s189_s11 = sshll.u32 %s181_s7, 4  ;;  %s618_s6 = smov [#allocation6]   ;;  %s190_s11 = int_to_ptr.vmem [resolvable:$true] %s189_s11 }
  0x26   : > { %s516_s19 = scalar_lea.vmem %s190_s11, 128  ;;  %s521_s8 = sshll.u32 %s618_s6, 4  ;;  %s522_s8 = int_to_ptr.vmem [resolvable:$false] %s521_s8 }
  0x27   : > { %p517_p12 = scmp.ne.s32.totalorder %s190_s11, %s516_s19  ;;  %s523_s10 = scalar_lea.vmem %s522_s8, 256 }
  0x28   : > { %p524_p1 = scmp.lt.s32.totalorder %s190_s11, %s522_s8  ;;  %p525_p2 = scmp.lt.s32.totalorder %s523_s10, %s516_s19 }
  0x29   : > { %p519_p6 = pnand %p517_p12, %p477_p3 }
  0x2a   : > { %p526_p4 = por %p525_p2, %p524_p1 }
  0x2b   : > { %p520_p7 = pneg %p519_p6 }
  0x2d   : > { %p527_p10 = pnand %p526_p4, %p520_p7 }
  0x2f   : > { %530 = shalt.err (!%p527_p10)
}
  0x30   : > { %418 = dma.hbm_to_vmem [thread:$0]  (!%p714_p0), %s187_s5, 128, %s190_s11, %s178_s18  }
  0x31   : > { %198 = sbr.rel (%p732_p5) target bundleno = 93 (0x5d), region = 32  ;;  %s748_s28 = sand.u32 (!%p732_p5), 1, %s599_s13  }
  0x32   : > { %s398_s29 = sshll.u32 (!%p732_p5), %s748_s28, 3  ;;  %s201_s30 = scalar_lea.sflag (!%p732_p5), [#allocation4], %s748_s28 }
  0x33   : > { %s204_s21 = scalar_lea.vmem (!%p732_p5), [#allocation3], %s398_s29 }
  0x36   : > { %582 = dma.done.wait (%p687_p8), %s201_s30, 128  }
  0x37   : > { %584 = vsyncadd (%p687_p8), %s201_s30, 4294967168  ;;  %s210_s9 = scalar_lea.sflag [#allocation7], %s748_s28  ;;  %s213_s23 = scalar_lea.vmem [#allocation6], %s398_s29 }
  0x38   : > { %586 = dma.done.wait (%p687_p8), %s210_s9, 128  }
  0x39   : > { %588 = vsyncadd (%p687_p8), %s210_s9, 4294967168  ;;  %v248_v0 = vld [vmem:[%s204_s21] sm:$0xff]  ;;  %v249_v2 = vld [vmem:[%s213_s23] sm:$0xff]  ;;  %s240_s5 = scalar_lea.vmem [#allocation8], %s398_s29  ;;  %s403_s11 = sshll.u32 %s607_s15, 7 }
  0x3a   : > { %v251_v1 = vadd.f32 1e-06, %v248_v0  ;;  %v250_v3 = vsub.f32 0.0, %v249_v2  ;;  %v401_v6 = vld [vmem:[%s806_s2] ss:$0 sm:$0xff]  ;;  %s286_s7 = sshll.u32 %s240_s5, 4  ;;  %s284_s19 = scalar_lea.hbm %s807_s3, %s403_s11  ;;  %s287_s7 = int_to_ptr.vmem [resolvable:$true] %s286_s7 }
  0x3b   : > { %s273_s6 = scalar_lea.sflag [#allocation5], %s748_s28  ;;  %s531_s8 = scalar_lea.vmem %s287_s7, 128 }
  0x3c   : > { %473 = vlog2.f32 %v251_v1  ;;  %p532_p8 = scmp.ne.s32.totalorder %s287_s7, %s531_s8  ;;  %s619_s10 = smov [#allocation8]  }
  0x3d   : > { %s535_s30 = sshll.u32 %s619_s10, 4  ;;  %s536_s30 = int_to_ptr.vmem [resolvable:$false] %s535_s30 }
  0x3e   : > { %p533_p0 = pnand %p532_p8, %p691_p9  ;;  %s537_s29 = scalar_lea.vmem %s536_s30, 256 }
  0x3f   : > { %p538_p13 = scmp.lt.s32.totalorder %s287_s7, %s536_s30  ;;  %p539_p5 = scmp.lt.s32.totalorder %s537_s29, %s531_s8 }
  0x40   : > { %p534_p3 = pneg %p533_p0 }
  0x41   : > { %p540_p12 = por %p539_p5, %p538_p13 }
  0x43   : > { %p541_p6 = pnand %p540_p12, %p534_p3 }
  0x49   : > { %v474_v4 = vpop.eup %473 }
  0x4a   : > { %v253_v5 = vmul.f32 0.6931472, %v474_v4 }
  0x4c   : > { %v254_v7 = vmul.f32 %v253_v5, %v250_v3 }
  0x4e   : > { %v262_v8 = vmul.f32 %v401_v6, %v254_v7 }
  0x50   : > { %271 = vst [vmem:[%s240_s5] sm:$0xff] %v262_v8 }
  0x51   : > { %544 = shalt.err (!%p541_p6)
}
  0x52   : > { %s545_s15 = scalar_lea.hbm %s284_s19, 128  ;;  %s549_s9 = scalar_lea.hbm %s807_s3, 256 }
  0x53   : > { %p546_p7 = scmp.ne.s32.totalorder %s284_s19, %s545_s15  ;;  %p550_p4 = scmp.lt.s32.totalorder %s284_s19, %s807_s3 }
  0x54   : > { %p551_p10 = scmp.lt.s32.totalorder %s549_s9, %s545_s15 }
  0x55   : > { %p547_p1 = pnand %p546_p7, %p691_p9 }
  0x56   : > { %p552_p8 = por %p551_p10, %p550_p4 }
  0x57   : > { %p548_p2 = pneg %p547_p1 }
  0x59   : > { %p553_p0 = pnand %p552_p8, %p548_p2 }
  0x5b   : > { %556 = shalt.err (!%p553_p0)
}
  0x5c   : > { %410 = dma.vmem_to_hbm [thread:$0]  (%p691_p9), %s287_s7, 128, %s284_s19, %s273_s6  }
  0x5d PF: > { %s298_s4 = sand.u32 1, %s595_s12   ;;  %p814_p3 = scmp.ge.s32.totalorder %s615_s17, 2 }
  0x5e   : > { %s299_s5 = scalar_lea.sflag [#allocation5], %s298_s4 }
  0x5f   : > { %p420_p13 = pnand %p814_p3, %p698_p11 }
  0x61   : > { %p421_p5 = pneg %p420_p13 }
  0x63   : > { %590 = dma.done.wait (%p421_p5), %s299_s5, 128  }
  0x64   : > { %592 = vsyncadd (%p421_p5), %s299_s5, 4294967168  ;;  %s22_s17 = sadd.s32 1, %s615_s17   ;;  %s815_s12 = smov %s599_s13 }
  0x65   : > { %p19_p12 = scmp.ge.s32.totalorder %s22_s17, 4   ;;  %s816_s13 = smov %s603_s14 }
  0x66   : > { %s817_s14 = smov %s696_s26  ;;  %s818_s15 = smov %s611_s16 }
  0x67   : > { %s819_s16 = smov %s821_s20  ;;  %21 = sbr.rel (!%p19_p12) target bundleno = 8 (0x8), region = 98 }
  0x6c   :  { %304 = vsyncpa [#allocation4], 1 }
  0x6d   :  { %306 = vsyncpa [#allocation4 + $0x1], 1 }
  0x6e   :  { %307 = vsyncpa [#allocation7], 1 }
  0x6f   :  { %309 = vsyncpa [#allocation7 + $0x1], 1 }
  0x70   :  { %310 = vsyncpa [#allocation5], 1 }
  0x71   :  { %312 = vsyncpa [#allocation5 + $0x1], 1 }

</bundles_post_ra>
